<compile_context>
chip_gen: v6e
topology: v6e:2x2x1
jax: 0.10.0
libtpu: 0.0.40
codegen_flags: <defaults>
</compile_context>

<pallas_src>
import functools

import jax
import jax.numpy as jnp
from jax.experimental import pallas as pl
from jax.experimental.pallas import tpu as pltpu


def _residual_kernel(seed_ref, x_ref, w_ref, b_ref, o_ref, *, p, training, tm, h):
    x = x_ref[...]                                                # (TM, H)
    # Inner module: Linear -> MXU matmul (f32 accumulate) + bias broadcast.
    y = jnp.dot(x, w_ref[...], preferred_element_type=jnp.float32)
    y = y + b_ref[...].astype(jnp.float32)                        # (1, H) broadcasts

    if training and p > 0.0:
        # Counter-based hash PRNG (murmur3 finalizer) over the global element
        # index -> independent mask per element regardless of tiling.
        tile_base = pl.program_id(0) * tm
        r = jax.lax.broadcasted_iota(jnp.int32, (tm, h), 0)
        c = jax.lax.broadcasted_iota(jnp.int32, (tm, h), 1)
        idx = (tile_base + r) * h + c                             # global linear index
        seed_u = seed_ref[0].astype(jnp.uint32)
        hb = idx.astype(jnp.uint32) + seed_u * jnp.uint32(0x9E3779B9)
        hb = hb ^ (hb >> 16)
        hb = hb * jnp.uint32(0x85EBCA6B)
        hb = hb ^ (hb >> 13)
        hb = hb * jnp.uint32(0xC2B2AE35)
        hb = hb ^ (hb >> 16)
        # Integer-threshold compare on the top 24 bits (exact, no float convert).
        u24 = (hb >> 8).astype(jnp.int32)                          # uniform in [0, 2^24)
        thresh = jnp.int32(int(round(p * float(1 << 24))))
        keep = u24 >= thresh
        m = jnp.where(keep, jnp.float32(1.0 / (1.0 - p)), jnp.float32(0.0))
        y = y * m

    # Residual add with args[0].
    o_ref[...] = (y + x.astype(jnp.float32)).astype(o_ref.dtype)


def residual_forward(x, w_t, b, seed, *, p, training=True, tm=512):
    """x: (B, S, H); w_t: (H_in, H_out) (torch weight transposed); b: (H,)."""
    B, S, H = x.shape
    M = B * S
    TM = min(tm, M)                      # 512-row tiles; whole slab if tiny
    x2 = x.reshape(M, H)
    b2 = b.reshape(1, H)
    seed_arr = jnp.asarray([seed], dtype=jnp.int32)

    kernel = functools.partial(
        _residual_kernel, p=float(p), training=bool(training), tm=TM, h=H)

    out = pl.pallas_call(
        kernel,
        out_shape=jax.ShapeDtypeStruct((M, H), x.dtype),
        grid=(pl.cdiv(M, TM),),
        in_specs=[
            pl.BlockSpec(memory_space=pltpu.MemorySpace.SMEM),    # seed (scalar)
            pl.BlockSpec((TM, H), lambda i: (i, 0)),              # x tile
            pl.BlockSpec((H, H), lambda i: (0, 0)),               # W resident in VMEM
            pl.BlockSpec((1, H), lambda i: (0, 0)),               # bias resident
        ],
        out_specs=pl.BlockSpec((TM, H), lambda i: (i, 0)),
        compiler_params=pltpu.CompilerParams(
            dimension_semantics=("parallel",)),                    # v7x: 2 TCs share tiles
    )(seed_arr, x2, w_t, b2)
    return out.reshape(B, S, H)


if __name__ == "__main__":
    B, S, H = 2, 8, 128
    p_drop = 0.1

    key = jax.random.PRNGKey(0)
    kx, kw, kb = jax.random.split(key, 3)
    x = jax.random.normal(kx, (B, S, H), dtype=jnp.float32)
    # torch.nn.Linear(H, H): weight (H_out, H_in); the kernel takes its transpose.
    w = jax.random.normal(kw, (H, H), dtype=jnp.float32) * (1.0 / jnp.sqrt(H))
    b = jax.random.normal(kb, (H,), dtype=jnp.float32) * 0.01
    w_t = w.T  # (H_in, H_out)

    # 1) Deterministic check (dropout disabled): must match pure-JAX reference.
    out_eval = residual_forward(x, w_t, b, seed=0, p=0.0, training=False)
    out_eval = jax.block_until_ready(out_eval)
    y_ref = (x.reshape(-1, H) @ w_t + b).reshape(B, S, H)
    ref = y_ref + x
    assert jnp.allclose(out_eval, ref, atol=1e-4, rtol=1e-4), "mismatch vs reference"

    # 2) Training-mode run with in-kernel dropout.
    out_train = residual_forward(x, w_t, b, seed=1234, p=p_drop, training=True)
    out_train = jax.block_until_ready(out_train)
    assert out_train.shape == (B, S, H)
    assert bool(jnp.all(jnp.isfinite(out_train)))
    # Every element must be either dropped (out == x) or kept-and-scaled.
    delta = out_train - x
    is_drop = jnp.isclose(delta, 0.0, atol=1e-5)
    is_keep = jnp.isclose(delta, y_ref / (1.0 - p_drop), atol=1e-3, rtol=1e-3)
    assert bool(jnp.all(is_drop | is_keep)), "dropout semantics violated"
    frac_drop = float(jnp.mean(is_drop.astype(jnp.float32)))
    assert frac_drop < 0.5, f"drop fraction {frac_drop} implausible for p={p_drop}"

    print("KERNEL_OK")
</pallas_src>

<mosaic_0001>
module attributes {stable_mosaic.version = 11 : i64} {
  func.func @_residual_kernel(%arg0: i32, %arg1: memref<1xi32, #tpu.memory_space<smem>>, %arg2: memref<16x128xf32, #tpu.memory_space<vmem>>, %arg3: memref<128x128xf32, #tpu.memory_space<vmem>>, %arg4: memref<1x128xf32, #tpu.memory_space<vmem>>, %arg5: memref<16x128xf32, #tpu.memory_space<vmem>>) attributes {dimension_semantics = [#tpu.dimension_semantics<parallel>], iteration_bounds = array<i64: 1>, scalar_prefetch = 0 : i64, scratch_operands = 0 : i64, tpu.core_type = #tpu.core_type<tc>, window_params = [{transform_indices = @transform_0, window_bounds = array<i64: 1>}, {transform_indices = @transform_1, window_bounds = array<i64: 16, 128>}, {pipeline_mode = #tpu.pipeline_mode<synchronous>, transform_indices = @transform_2, window_bounds = array<i64: 128, 128>}, {pipeline_mode = #tpu.pipeline_mode<synchronous>, transform_indices = @transform_3, window_bounds = array<i64: 1, 128>}, {transform_indices = @transform_4, window_bounds = array<i64: 16, 128>}]} {
    %c0 = arith.constant 0 : index
    %c0_0 = arith.constant 0 : index
    %0 = vector.load %arg2[%c0, %c0_0] : memref<16x128xf32, #tpu.memory_space<vmem>>, vector<16x128xf32>
    %c0_1 = arith.constant 0 : index
    %c0_2 = arith.constant 0 : index
    %1 = vector.load %arg3[%c0_1, %c0_2] : memref<128x128xf32, #tpu.memory_space<vmem>>, vector<128x128xf32>
    %cst = arith.constant dense<0.000000e+00> : vector<16x128xf32>
    %2 = tpu.matmul %0, %1, %cst {dimension_numbers = #tpu.dot_dimension_numbers<[1], [0], [0], [1], [0, 0, 1, 1], [], []>} : vector<16x128xf32>, vector<128x128xf32>, vector<16x128xf32> -> vector<16x128xf32>
    %c0_3 = arith.constant 0 : index
    %c0_4 = arith.constant 0 : index
    %3 = vector.load %arg4[%c0_3, %c0_4] : memref<1x128xf32, #tpu.memory_space<vmem>>, vector<1x128xf32>
    %4 = vector.broadcast %3 : vector<1x128xf32> to vector<16x128xf32>
    %5 = arith.addf %2, %4 : vector<16x128xf32>
    %6 = arith.addf %5, %0 : vector<16x128xf32>
    %c0_5 = arith.constant 0 : index
    %c0_6 = arith.constant 0 : index
    %7 = vector.load %arg5[%c0_5, %c0_6] : memref<16x128xf32, #tpu.memory_space<vmem>>, vector<16x128xf32>
    tpu.vector_store %arg5[%c0_5, %c0_6], %6 {strides = array<i32>} : memref<16x128xf32, #tpu.memory_space<vmem>>, vector<16x128xf32>,
    return
  }
  func.func @transform_0(%arg0: i32) -> i32 {
    %c0_i32 = arith.constant 0 : i32
    %c0_i32_0 = arith.constant 0 : i32
    return %c0_i32 : i32
  }
  func.func @transform_1(%arg0: i32) -> (i32, i32) {
    %c0_i32 = arith.constant 0 : i32
    %c0_i32_0 = arith.constant 0 : i32
    return %arg0, %c0_i32 : i32, i32
  }
  func.func @transform_2(%arg0: i32) -> (i32, i32) {
    %c0_i32 = arith.constant 0 : i32
    %c0_i32_0 = arith.constant 0 : i32
    %c0_i32_1 = arith.constant 0 : i32
    return %c0_i32, %c0_i32_0 : i32, i32
  }
  func.func @transform_3(%arg0: i32) -> (i32, i32) {
    %c0_i32 = arith.constant 0 : i32
    %c0_i32_0 = arith.constant 0 : i32
    %c0_i32_1 = arith.constant 0 : i32
    return %c0_i32, %c0_i32_0 : i32, i32
  }
  func.func @transform_4(%arg0: i32) -> (i32, i32) {
    %c0_i32 = arith.constant 0 : i32
    %c0_i32_0 = arith.constant 0 : i32
    return %arg0, %c0_i32 : i32, i32
  }
}

</mosaic_0001>

<bundles_post_ra>
// kernel: tpu_custom_call.1
= control target key start
LH: loop header
LB: loop body
LE: loop exit
PB: predicated region body
PF: predicated region fallthrough
CT: control target
= control target key end

     0   :  { %10 = vsyncpa [#allocation4], 0  ;;  %s345_s0 = inlined_call_operand.<no memory space> [shape: s32[1], index: 0, kind: input, shape index: {}]   ;;  %s346_s1 = inlined_call_operand.hbm [shape: f32[16,128], index: 1, kind: input, shape index: {}]   ;;  %s347_s2 = inlined_call_operand.hbm [shape: f32[128,128], index: 2, kind: input, shape index: {}]   ;;  %s348_s3 = inlined_call_operand.vmem [shape: f32[1,128], index: 3, kind: input, shape index: {}]   ;;  %s349_s4 = inlined_call_operand.hbm [shape: f32[16,128], index: 4, kind: output, shape index: {}]  }
   0x1   :  { %11 = vsyncpa [#allocation7], 0 }
   0x2   :  { %12 = vsyncpa [#allocation5], 0  ;;  %s294_s15 = smov [#allocation3]  }
   0x3   :  { %s20_s16 = sshll.u32 %s294_s15, 4  ;;  %s21_s16 = int_to_ptr.vmem [resolvable:$true] %s20_s16 }
   0x4   :  { %s236_s17 = scalar_lea.vmem %s21_s16, 256  ;;  %p241_p1 = scmp.lt.s32.totalorder %s21_s16, %s21_s16 }
   0x5   :  { %p237_p0 = scmp.ne.s32.totalorder %s21_s16, %s236_s17  ;;  %p242_p2 = scmp.lt.s32.totalorder %s236_s17, %s236_s17 }
   0x7   :  { %p243_p3 = por %p242_p2, %p241_p1 }
   0x9   :  { %p244_p4 = pnand %p243_p3, %p237_p0 }
   0xb   :  { %247 = shalt.err (!%p244_p4)
}
   0xc   :  { %s295_s0 = smov 128   ;;  %s296_s18 = smov 8  }
   0xd   :  { %26 = dma.hbm_to_vmem [thread:$0]  %s346_s1, 256, %s21_s16, [#allocation4], %s295_s0, %s295_s0, %s296_s18  }
   0xe   :  { %s297_s21 = smov [#allocation6]  }
   0xf   :  { %s32_s22 = sshll.u32 %s297_s21, 4  ;;  %s33_s22 = int_to_ptr.vmem [resolvable:$true] %s32_s22 }
  0x10   :  { %s256_s23 = scalar_lea.vmem %s33_s22, 2048  ;;  %p261_p6 = scmp.lt.s32.totalorder %s33_s22, %s33_s22 }
  0x11   :  { %p257_p5 = scmp.ne.s32.totalorder %s33_s22, %s256_s23  ;;  %p262_p7 = scmp.lt.s32.totalorder %s256_s23, %s256_s23 }
  0x13   :  { %p263_p8 = por %p262_p7, %p261_p6 }
  0x15   :  { %p264_p9 = pnand %p263_p8, %p257_p5 }
  0x17   :  { %267 = shalt.err (!%p264_p9)
}
  0x18   :  { %38 = dma.hbm_to_vmem [thread:$0]  %s347_s2, 2048, %s33_s22, [#allocation7], %s295_s0, %s295_s0, %s296_s18  }
  0x19   :  { %288 = dma.done.wait [#allocation4], 256  }
  0x1a   :  { %289 = vsyncadd [#allocation4], 4294967040 }
  0x1b   :  { %290 = dma.done.wait [#allocation7], 2048  }
  0x1c   :  { %291 = vsyncadd [#allocation7], 4294965248  ;;  %v64_v0 = vld [vmem:[#allocation6 + $0x78] sm:$0xff]  ;;  %v63_v1 = vld [vmem:[#allocation6 + $0x70] sm:$0xff]  ;;  %s298_s26 = smov [#allocation8]  }
  0x1d   :  { %188 = vmatprep.subr.mxu0 %v64_v0  ;;  %v62_v2 = vld [vmem:[#allocation6 + $0x68] sm:$0xff]  ;;  %v61_v3 = vld [vmem:[#allocation6 + $0x60] sm:$0xff]  ;;  %v47_v4 = vld [vmem:[#allocation3] sm:$0xff]  ;;  %s156_s27 = sshll.u32 %s298_s26, 4  ;;  %s157_s27 = int_to_ptr.vmem [resolvable:$true] %s156_s27 }
  0x1e   :  { %189 = vmatpush3.msra.mxu0 %v64_v0  ;;  %v60_v5 = vld [vmem:[#allocation6 + $0x58] sm:$0xff]  ;;  %220 = vmatprep.mubr.f32.mxu0 %v47_v4  ;;  %v59_v6 = vld [vmem:[#allocation6 + $0x50] sm:$0xff]  ;;  %v58_v7 = vld [vmem:[#allocation6 + $0x48] sm:$0xff]  ;;  %s268_s28 = scalar_lea.vmem %s157_s27, 256  ;;  %p273_p11 = scmp.lt.s32.totalorder %s157_s27, %s157_s27 }
  0x1f   :  { %190 = vmatprep.subr.mxu0 %v63_v1  ;;  %v57_v8 = vld [vmem:[#allocation6 + $0x40] sm:$0xff]  ;;  %v56_v9 = vld [vmem:[#allocation6 + $0x38] sm:$0xff]  ;;  %v55_v10 = vld [vmem:[#allocation6 + $0x30] sm:$0xff]  ;;  %p269_p10 = scmp.ne.s32.totalorder %s157_s27, %s268_s28  ;;  %p274_p12 = scmp.lt.s32.totalorder %s268_s28, %s268_s28 }
  0x20   :  { %191 = vmatpush3.msra.mxu0 %v63_v1  ;;  %v54_v11 = vld [vmem:[#allocation6 + $0x28] sm:$0xff]  ;;  %v53_v12 = vld [vmem:[#allocation6 + $0x20] sm:$0xff]  ;;  %v52_v13 = vld [vmem:[#allocation6 + $0x18] sm:$0xff] }
  0x21   :  { %192 = vmatprep.subr.mxu0 %v62_v2  ;;  %v51_v14 = vld [vmem:[#allocation6 + $0x10] sm:$0xff]  ;;  %v50_v15 = vld [vmem:[#allocation6 + $0x8] sm:$0xff]  ;;  %v49_v16 = vld [vmem:[#allocation6] sm:$0xff]  ;;  %p275_p13 = por %p274_p12, %p273_p11 }
  0x22   :  { %193 = vmatpush3.msra.mxu0 %v62_v2  ;;  %v48_v17 = vld [vmem:[#allocation3 + $0x8] sm:$0xff]  ;;  %v169_v18 = vld [vmem:[%s348_s3] ss:$0 sm:$0xff] }
  0x23   :  { %194 = vmatprep.subr.mxu0 %v61_v3  ;;  %p276_p0 = pnand %p275_p13, %p269_p10 }
  0x24   :  { %195 = vmatpush3.msra.mxu0 %v61_v3 }
  0x25   :  { %196 = vmatprep.subr.mxu0 %v60_v5 }
  0x26   :  { %197 = vmatpush3.msra.mxu0 %v60_v5 }
  0x27   :  { %198 = vmatprep.subr.mxu0 %v59_v6 }
  0x28   :  { %199 = vmatpush3.msra.mxu0 %v59_v6 }
  0x29   :  { %200 = vmatprep.subr.mxu0 %v58_v7 }
  0x2a   :  { %201 = vmatpush3.msra.mxu0 %v58_v7 }
  0x2b   :  { %202 = vmatprep.subr.mxu0 %v57_v8 }
  0x2c   :  { %203 = vmatpush3.msra.mxu0 %v57_v8 }
  0x2d   :  { %204 = vmatprep.subr.mxu0 %v56_v9 }
  0x2e   :  { %205 = vmatpush3.msra.mxu0 %v56_v9 }
  0x2f   :  { %206 = vmatprep.subr.mxu0 %v55_v10 }
  0x30   :  { %207 = vmatpush3.msra.mxu0 %v55_v10 }
  0x31   :  { %208 = vmatprep.subr.mxu0 %v54_v11 }
  0x32   :  { %209 = vmatpush3.msra.mxu0 %v54_v11 }
  0x33   :  { %210 = vmatprep.subr.mxu0 %v53_v12 }
  0x34   :  { %211 = vmatpush3.msra.mxu0 %v53_v12 }
  0x35   :  { %212 = vmatprep.subr.mxu0 %v52_v13 }
  0x36   :  { %213 = vmatpush3.msra.mxu0 %v52_v13 }
  0x37   :  { %214 = vmatprep.subr.mxu0 %v51_v14 }
  0x38   :  { %215 = vmatpush3.msra.mxu0 %v51_v14 }
  0x39   :  { %216 = vmatprep.subr.mxu0 %v50_v15 }
  0x3a   :  { %217 = vmatpush3.msra.mxu0 %v50_v15 }
  0x3b   :  { %218 = vmatprep.subr.mxu0 %v49_v16 }
  0x3c   :  { %219 = vmatpush3.msra.mxu0 %v49_v16 }
  0x3d   :  { %221 = vmatmul.mubr.f32.vlgmr.msra.gmra.mxu0 %v48_v17 }
  0xfd   :  { %v222_v19 = vpop.f32.mrf.mxu0 }
  0xfe   :  { %v144_v20 = vadd.f32 %v222_v19, %v169_v18 }
  0xff   :  { %v138_v21 = vpop.f32.mrf.mxu0 }
 0x100   :  { %v148_v22 = vadd.f32 %v144_v20, %v48_v17  ;;  %v139_v23 = vadd.f32 %v169_v18, %v138_v21 }
 0x102   :  { %150 = vst [vmem:[#allocation8 + $0x8] sm:$0xff] %v148_v22  ;;  %v147_v24 = vadd.f32 %v139_v23, %v47_v4 }
 0x104   :  { %149 = vst [vmem:[#allocation8] sm:$0xff] %v147_v24 }
 0x105   :  { %279 = shalt.err (!%p276_p0)
}
 0x106   :  { %162 = dma.vmem_to_hbm [thread:$0]  %s157_s27, 256, %s349_s4, [#allocation5], %s295_s0, %s295_s0, %s296_s18  }
 0x107   :  { %292 = dma.done.wait [#allocation5], 256  }
 0x108   :  { %293 = vsyncadd [#allocation5], 4294967040 }
 0x109   :  { %166 = vsyncpa [#allocation4], 1 }
 0x10a   :  { %167 = vsyncpa [#allocation7], 1 }
 0x10b   :  { %168 = vsyncpa [#allocation5], 1 }

</bundles_post_ra>
